<compile_context>
chip_gen: v7x
topology: tpu7x:2x2x1
jax: 0.10.0
libtpu: 0.0.40
codegen_flags: <defaults>
</compile_context>

<pallas_src>
import jax
import jax.numpy as jnp
from jax import lax
from jax.experimental import pallas as pl
from jax.experimental.pallas import tpu as pltpu


def _cdiv(a, b):
    return -(-a // b)


def _round_up(a, b):
    return _cdiv(a, b) * b


def _adaptive_gate_kernel(x_ref, w1_ref, b1_ref, w2_ref, b2_ref, o_ref):
    # x_ref : [tm, D]  input dtype        w1_ref: [D, H]  bf16 (VMEM-resident)
    # b1_ref: [1, H]   f32 (resident)     w2_ref: [1, H]  f32  (resident fc2 row)
    # b2_ref: [1]      f32 (SMEM scalar)  o_ref : [1, tm] f32  (lane-dense gate row)
    x = x_ref[...].astype(jnp.bfloat16)                       # in-kernel cast (VPU), no wrapper copy
    h = jnp.dot(x, w1_ref[...], preferred_element_type=jnp.float32)   # fc1 on MXU, f32 acc
    h = jnp.maximum(h + b1_ref[...], 0.0)                              # bias + ReLU (VPU, f32)
    # fc2 with out_features == 1: contract hidden of h against the fc2 weight
    # row, producing the result directly as a lane-dense [1, tm] row (no
    # lane-sparse [tm, 1] intermediate for the bias / sigmoid / store).
    z = lax.dot_general(w2_ref[...], h,
                        dimension_numbers=(((1,), (1,)), ((), ())),
                        preferred_element_type=jnp.float32)             # [1, tm]
    o_ref[...] = jax.nn.sigmoid(z + b2_ref[0]).astype(o_ref.dtype)


def adaptive_gate(input_feats, w1, b1, w2, b2, *, tm_target=2048):
    """input_feats: [..., input_size] -> gate: [..., 1] (= sigmoid(fc2(relu(fc1(x)))))."""
    *lead, d = input_feats.shape
    x2d = input_feats.reshape(-1, d)
    m = x2d.shape[0]
    hidden = w1.shape[1]

    # Tiny-M corner: pad to >= 8 rows so an 8-multiple row tile never exceeds
    # the array (negligible copy; never triggered for realistic M).
    if m < 8:
        x2d = jnp.pad(x2d, ((0, 8 - m), (0, 0)))
    m_eff = x2d.shape[0]
    x_isz = x2d.dtype.itemsize

    # ---- VMEM-aware row-tile selection --------------------------------------
    try:
        vmem_cap = int(pltpu.get_tpu_info().vmem_capacity_bytes)
    except Exception:
        vmem_cap = 64 << 20  # v7x per-TensorCore VMEM (smallest) as a safe fallback
    # Per-row VMEM: double-buffered x tile (+ bf16 copy) + f32 h tile + slack.
    per_row = 2 * d * x_isz + 2 * d + 6 * hidden + 16
    # Resident operands (budgeted as 2 pipeline buffers even though their
    # index_map is constant) + 1 MiB slack.
    # TODO(synk): very large d*hidden would need a K-tiled fc1; not needed for a gate MLP.
    fixed = 2 * (2 * d * hidden + 8 * hidden) + (1 << 20)
    budget = (vmem_cap * 11) // 20                      # ~55% of physical VMEM
    tm_vmem = max(8, (budget - fixed) // per_row)

    tm = min(tm_target, tm_vmem, (m_eff // 8) * 8)
    tm = max(8, (tm // 8) * 8)
    # v7x has 2 TensorCores: give the "parallel" row axis >= 2 (ideally >= 4)
    # tiles when there is enough work, keeping tiles >= 512 rows (HBM roofline).
    for n_tiles in (4, 2):
        cand = _round_up(_cdiv(m_eff, n_tiles), 8)
        if cand >= 512:
            tm = min(tm, cand)
            break

    num_tiles = _cdiv(m_eff, tm)

    # ---- operands ------------------------------------------------------------
    # x is streamed at its incoming dtype (cast to bf16 inside the kernel).
    w1_bf16 = w1.astype(jnp.bfloat16)                    # [D, H], VMEM-resident
    b1_2d = b1.reshape(1, hidden).astype(jnp.float32)    # [1, H]
    w2_row = w2.reshape(1, hidden).astype(jnp.float32)   # fc2 weight as a lane row
    b2_1d = b2.reshape(1).astype(jnp.float32)            # SMEM scalar

    vmem_need = fixed + per_row * tm + 8 * tm
    vmem_limit = int(min((vmem_cap * 9) // 10, max(2 * vmem_need, 32 << 20)))

    cost = pl.CostEstimate(
        flops=int(2 * m_eff * d * hidden + 2 * m_eff * hidden + 4 * m_eff),
        transcendentals=int(m_eff),                      # sigmoid
        bytes_accessed=int(m_eff * d * x_isz             # x stream at its true dtype
                           + 2 * d * hidden              # resident bf16 w1 (read once)
                           + 8 * hidden + 4              # b1, w2 row, b2
                           + 4 * num_tiles * tm),        # lane-dense f32 output
    )

    out = pl.pallas_call(
        _adaptive_gate_kernel,
        out_shape=jax.ShapeDtypeStruct((num_tiles, tm), jnp.float32),
        grid_spec=pltpu.PrefetchScalarGridSpec(
            num_scalar_prefetch=0,
            grid=(num_tiles,),
            in_specs=[
                pl.BlockSpec((tm, d), lambda i: (i, 0)),            # x (streamed; trailing block partial)
                pl.BlockSpec((d, hidden), lambda i: (0, 0)),        # w1 (VMEM-resident)
                pl.BlockSpec((1, hidden), lambda i: (0, 0)),        # b1 (VMEM-resident)
                pl.BlockSpec((1, hidden), lambda i: (0, 0)),        # w2 row (VMEM-resident)
                pl.BlockSpec(memory_space=pltpu.MemorySpace.SMEM),  # b2 scalar
            ],
            out_specs=pl.BlockSpec((1, tm), lambda i: (i, 0)),      # lane-dense gate row per tile
        ),
        compiler_params=pltpu.CompilerParams(
            dimension_semantics=("parallel",),
            vmem_limit_bytes=vmem_limit,
        ),
        cost_estimate=cost,
    )(x2d, w1_bf16, b1_2d, w2_row, b2_1d)

    # Tile i holds gates for rows [i*tm, (i+1)*tm) in order; garbage rows from
    # the trailing partial block are row-independent and sliced off here.
    gate = out.reshape(-1)[:m]
    return gate.reshape(*lead, 1)


def _reference(input_feats, w1, b1, w2, b2):
    h = jnp.maximum(input_feats @ w1 + b1, 0.0)
    return jax.nn.sigmoid(h @ w2 + b2)


if __name__ == "__main__":
    # Shapes implied by the module: Linear(input_size, hidden_size) -> Linear(hidden_size, 1)
    batch, seq, input_size, hidden_size = 2, 8, 32, 32

    key = jax.random.PRNGKey(0)
    kx, kw1, kb1, kw2, kb2 = jax.random.split(key, 5)

    x = jax.random.normal(kx, (batch, seq, input_size), dtype=jnp.float32)

    # PyTorch fc1.weight is [hidden, input]; we store the transpose so the kernel does x @ w1.
    w1 = jax.random.normal(kw1, (input_size, hidden_size), dtype=jnp.float32) * 0.1
    b1 = jax.random.normal(kb1, (hidden_size,), dtype=jnp.float32) * 0.1
    w2 = jax.random.normal(kw2, (hidden_size, 1), dtype=jnp.float32) * 0.1
    b2 = jax.random.normal(kb2, (1,), dtype=jnp.float32) * 0.1

    out = adaptive_gate(x, w1, b1, w2, b2)
    jax.block_until_ready(out)

    ref = _reference(x, w1, b1, w2, b2)
    assert out.shape == (batch, seq, 1), out.shape
    # x / w1 go through the MXU as bf16 -> compare against f32 reference with a widened tolerance.
    assert jnp.allclose(out, ref, atol=1e-2, rtol=1e-2), "mismatch vs reference"

    # Extra check exercising the partial trailing block + multi-tile path (M=21).
    x_odd = jax.random.normal(kx, (3, 7, input_size), dtype=jnp.float32)
    out_odd = adaptive_gate(x_odd, w1, b1, w2, b2)
    jax.block_until_ready(out_odd)
    ref_odd = _reference(x_odd, w1, b1, w2, b2)
    assert out_odd.shape == (3, 7, 1), out_odd.shape
    assert jnp.allclose(out_odd, ref_odd, atol=1e-2, rtol=1e-2), "mismatch vs reference (partial block)"

    print("KERNEL_OK")
</pallas_src>

<mosaic_0001>
module attributes {stable_mosaic.version = 11 : i64} {
  func.func @_adaptive_gate_kernel(%arg0: i32, %arg1: memref<16x32xf32, #tpu.memory_space<vmem>>, %arg2: memref<32x32xbf16, #tpu.memory_space<vmem>>, %arg3: memref<1x32xf32, #tpu.memory_space<vmem>>, %arg4: memref<1x32xf32, #tpu.memory_space<vmem>>, %arg5: memref<1xf32, #tpu.memory_space<smem>>, %arg6: memref<1x16xf32, #tpu.memory_space<vmem>>) attributes {dimension_semantics = [#tpu.dimension_semantics<parallel>], iteration_bounds = array<i64: 1>, scalar_prefetch = 0 : i64, scratch_operands = 0 : i64, tpu.core_type = #tpu.core_type<tc>, window_params = [{transform_indices = @transform_0, window_bounds = array<i64: 16, 32>}, {pipeline_mode = #tpu.pipeline_mode<synchronous>, transform_indices = @transform_1, window_bounds = array<i64: 32, 32>}, {pipeline_mode = #tpu.pipeline_mode<synchronous>, transform_indices = @transform_2, window_bounds = array<i64: 1, 32>}, {pipeline_mode = #tpu.pipeline_mode<synchronous>, transform_indices = @transform_3, window_bounds = array<i64: 1, 32>}, {transform_indices = @transform_4, window_bounds = array<i64: 1>}, {transform_indices = @transform_5, window_bounds = array<i64: 1, 16>}]} {
    %c0 = arith.constant 0 : index
    %c0_0 = arith.constant 0 : index
    %0 = vector.load %arg1[%c0, %c0_0] : memref<16x32xf32, #tpu.memory_space<vmem>>, vector<16x32xf32>
    %1 = arith.truncf %0 : vector<16x32xf32> to vector<16x32xbf16>
    %c0_1 = arith.constant 0 : index
    %c0_2 = arith.constant 0 : index
    %2 = vector.load %arg2[%c0_1, %c0_2] : memref<32x32xbf16, #tpu.memory_space<vmem>>, vector<32x32xbf16>
    %cst = arith.constant dense<0.000000e+00> : vector<16x32xf32>
    %3 = tpu.matmul %1, %2, %cst {dimension_numbers = #tpu.dot_dimension_numbers<[1], [0], [0], [1], [0, 0, 1, 1], [], []>} : vector<16x32xbf16>, vector<32x32xbf16>, vector<16x32xf32> -> vector<16x32xf32>
    %c0_3 = arith.constant 0 : index
    %c0_4 = arith.constant 0 : index
    %4 = vector.load %arg3[%c0_3, %c0_4] : memref<1x32xf32, #tpu.memory_space<vmem>>, vector<1x32xf32>
    %5 = vector.broadcast %4 : vector<1x32xf32> to vector<16x32xf32>
    %6 = arith.addf %3, %5 : vector<16x32xf32>
    %cst_5 = arith.constant 0.000000e+00 : f32
    %7 = vector.broadcast %cst_5 : f32 to vector<16x32xf32>
    %8 = arith.maximumf %6, %7 : vector<16x32xf32>
    %c0_6 = arith.constant 0 : index
    %c0_7 = arith.constant 0 : index
    %9 = vector.load %arg4[%c0_6, %c0_7] : memref<1x32xf32, #tpu.memory_space<vmem>>, vector<1x32xf32>
    %cst_8 = arith.constant dense<0.000000e+00> : vector<1x16xf32>
    %10 = tpu.matmul %9, %8, %cst_8 {dimension_numbers = #tpu.dot_dimension_numbers<[1], [1], [0], [0], [0, 0, 1, 0], [], []>} : vector<1x32xf32>, vector<16x32xf32>, vector<1x16xf32> -> vector<1x16xf32>
    %c0_9 = arith.constant 0 : index
    %11 = memref.load %arg5[%c0_9] : memref<1xf32, #tpu.memory_space<smem>>
    %12 = vector.broadcast %11 : f32 to vector<1x16xf32>
    %13 = arith.addf %10, %12 : vector<1x16xf32>
    %14 = arith.negf %13 : vector<1x16xf32>
    %15 = math.exp %14 : vector<1x16xf32>
    %cst_10 = arith.constant 1.000000e+00 : f32
    %16 = vector.broadcast %cst_10 : f32 to vector<1x16xf32>
    %17 = arith.addf %16, %15 : vector<1x16xf32>
    %18 = arith.divf %16, %17 : vector<1x16xf32>
    %c0_11 = arith.constant 0 : index
    %c0_12 = arith.constant 0 : index
    %19 = vector.load %arg6[%c0_11, %c0_12] : memref<1x16xf32, #tpu.memory_space<vmem>>, vector<1x16xf32>
    tpu.vector_store %arg6[%c0_11, %c0_12], %18 {strides = array<i32>} : memref<1x16xf32, #tpu.memory_space<vmem>>, vector<1x16xf32>,
    return
  }
  func.func @transform_0(%arg0: i32) -> (i32, i32) {
    %c0_i32 = arith.constant 0 : i32
    %c0_i32_0 = arith.constant 0 : i32
    return %arg0, %c0_i32 : i32, i32
  }
  func.func @transform_1(%arg0: i32) -> (i32, i32) {
    %c0_i32 = arith.constant 0 : i32
    %c0_i32_0 = arith.constant 0 : i32
    %c0_i32_1 = arith.constant 0 : i32
    return %c0_i32, %c0_i32_0 : i32, i32
  }
  func.func @transform_2(%arg0: i32) -> (i32, i32) {
    %c0_i32 = arith.constant 0 : i32
    %c0_i32_0 = arith.constant 0 : i32
    %c0_i32_1 = arith.constant 0 : i32
    return %c0_i32, %c0_i32_0 : i32, i32
  }
  func.func @transform_3(%arg0: i32) -> (i32, i32) {
    %c0_i32 = arith.constant 0 : i32
    %c0_i32_0 = arith.constant 0 : i32
    %c0_i32_1 = arith.constant 0 : i32
    return %c0_i32, %c0_i32_0 : i32, i32
  }
  func.func @transform_4(%arg0: i32) -> i32 {
    %c0_i32 = arith.constant 0 : i32
    %c0_i32_0 = arith.constant 0 : i32
    return %c0_i32 : i32
  }
  func.func @transform_5(%arg0: i32) -> (i32, i32) {
    %c0_i32 = arith.constant 0 : i32
    %c0_i32_0 = arith.constant 0 : i32
    return %arg0, %c0_i32 : i32, i32
  }
}

</mosaic_0001>

<bundles_post_ra>
// kernel: tpu_custom_call.1
= control target key start
LH: loop header
LB: loop body
LE: loop exit
PB: predicated region body
PF: predicated region fallthrough
CT: control target
= control target key end

     0   :  { %11 = vsyncpa [#allocation4], 0  ;;  %s440_s0 = inlined_call_operand.hbm [shape: f32[16,32], index: 0, kind: input, shape index: {}]   ;;  %s441_s1 = inlined_call_operand.hbm [shape: bf16[32,32], index: 1, kind: input, shape index: {}]   ;;  %s442_s2 = inlined_call_operand.vmem [shape: f32[1,32], index: 2, kind: input, shape index: {}]   ;;  %s443_s3 = inlined_call_operand.vmem [shape: f32[1,32], index: 3, kind: input, shape index: {}]   ;;  %s444_s4 = inlined_call_operand.<no memory space> [shape: f32[1], index: 4, kind: input, shape index: {}]   ;;  %s445_s5 = inlined_call_operand.hbm [shape: f32[1,16], index: 5, kind: output, shape index: {}]  }
   0x1   :  { %12 = vsyncpa [#allocation7], 0 }
   0x2   :  { %13 = vsyncpa [#allocation5], 0  ;;  %s351_s18 = smov [#allocation3]   ;;  %s279_s22 = scalar_lea.hbm %s440_s0, 256 }
   0x3   :  { %s19_s19 = sshll.u32 %s351_s18, 4  ;;  %p280_p0 = scmp.ne.s32.totalorder %s440_s0, %s279_s22  ;;  %s20_s19 = int_to_ptr.vmem [resolvable:$true] %s19_s19 }
   0x4   :  { %p283_p1 = scmp.lt.u32.totalorder %s279_s22, %s440_s0 }
   0x6   :  { %p285_p2 = pnand %p283_p1, %p280_p0 }
   0x8   :  { %288 = shalt.err (!%p285_p2)
}
   0x9   :  { %s289_s27 = scalar_lea.vmem %s20_s19, 256  ;;  %p294_p4 = scmp.lt.s32.totalorder %s20_s19, %s20_s19 }
   0xa   :  { %p290_p3 = scmp.ne.s32.totalorder %s20_s19, %s289_s27  ;;  %p295_p5 = scmp.lt.s32.totalorder %s289_s27, %s289_s27 }
   0xc   :  { %p296_p6 = por %p295_p5, %p294_p4 }
   0xe   :  { %p297_p7 = pnand %p296_p6, %p290_p3 }
  0x10   :  { %300 = shalt.err (!%p297_p7)
}
  0x11   :  { %s352_s28 = smov 128   ;;  %s353_s29 = smov 8  }
  0x12   :  { %25 = dma.hbm_to_vmem [thread:$0]  %s440_s0, 256, %s20_s19, [#allocation4], %s352_s28, %s352_s28, %s353_s29  }
  0x13   :  { %s354_s7 = smov [#allocation6]   ;;  %s301_s11 = scalar_lea.hbm %s441_s1, 256 }
  0x14   :  { %s31_s8 = sshll.u32 %s354_s7, 4  ;;  %p302_p8 = scmp.ne.s32.totalorder %s441_s1, %s301_s11  ;;  %s32_s8 = int_to_ptr.vmem [resolvable:$true] %s31_s8 }
  0x15   :  { %p305_p9 = scmp.lt.u32.totalorder %s301_s11, %s441_s1 }
  0x17   :  { %p307_p10 = pnand %p305_p9, %p302_p8 }
  0x19   :  { %310 = shalt.err (!%p307_p10)
}
  0x1a   :  { %s311_s16 = scalar_lea.vmem %s32_s8, 256  ;;  %p316_p12 = scmp.lt.s32.totalorder %s32_s8, %s32_s8 }
  0x1b   :  { %p312_p11 = scmp.ne.s32.totalorder %s32_s8, %s311_s16  ;;  %p317_p13 = scmp.lt.s32.totalorder %s311_s16, %s311_s16 }
  0x1d   :  { %p318_p0 = por %p317_p13, %p316_p12 }
  0x1f   :  { %p319_p1 = pnand %p318_p0, %p312_p11 }
  0x21   :  { %322 = shalt.err (!%p319_p1)
}
  0x22   :  { %s355_s0 = smov 64   ;;  %s356_s17 = smov 4  }
  0x23   :  { %37 = dma.hbm_to_vmem [thread:$0]  %s441_s1, 256, %s32_s8, [#allocation7], %s355_s0, %s355_s0, %s356_s17  }
  0x24   :  { %345 = dma.done.wait [#allocation4], 256  }
  0x25   :  { %346 = vsyncadd [#allocation4], 4294967040 }
  0x26   :  { %347 = dma.done.wait [#allocation7], 256  }
  0x27   :  { %348 = vsyncadd [#allocation7], 4294967040  ;;  %v357_v0 = vmov 0.0   ;;  %vm358_vm0 = vmmov 0   ;;  %v273_v1 = vld [vmem:[#allocation6] sm:$0xff]   ;;  %v274_v2 = vld [vmem:[#allocation6 + $0x8] sm:$0xff]   ;;  %v126_v18 = vstv %s444_s4 }
  0x28   :  { %244 = vmatprep.subr.bf16.mxu0 %v357_v0  ;;  %248 = vmatprep.mubr.msk.bf16.mxu0 %vm358_vm0, %v357_v0  ;;  %v51_v3 = vld [vmem:[#allocation3] sm:$0xff]  ;;  %v52_v4 = vld [vmem:[#allocation3 + $0x8] sm:$0xff]  ;;  %vm77_vm1 = vcmask 261120   ;;  %v359_v6 = vmov 0.0|0.0   ;;  %s360_s24 = smov [#allocation8]   ;;  %vm212_vm3 = vcmask 122880  }
  0x29   :  { %256 = vmatprep.mubr.msk.f32.mxu1 %vm358_vm0, %v357_v0  ;;  %245 = vmatpush3.bf16.msra.mxu0 %v273_v1  ;;  %v53_v5 = vpack.c.bf16 %v52_v4, %v51_v3  ;;  %v230_v7 = vld [vmem:[%s442_s2] ss:$0 sm:$0xff]  ;;  %vm261_vm2 = vmpackc.low %vm77_vm1, %vm77_vm1  ;;  %s220_s25 = sshll.u32 %s360_s24, 4  ;;  %s221_s25 = int_to_ptr.vmem [resolvable:$true] %s220_s25 }
  0x2a   :  { %246 = vmatprep.subr.bf16.mxu0 %v357_v0  ;;  %259 = vmatprep.subr.bf16.mxu1 %v359_v6  ;;  %v124_v17 = vld [vmem:[%s443_s3] sm:$0x1]  ;;  %s323_s3 = scalar_lea.vmem %s221_s25, 16  ;;  %s327_s26 = scalar_lea.vmem %s221_s25, 32 }
  0x2b   :  { %p324_p2 = scmp.ne.s32.totalorder %s221_s25, %s323_s3  ;;  %p328_p3 = scmp.lt.s32.totalorder %s221_s25, %s221_s25 }
  0x2c   :  { %p329_p4 = scmp.lt.s32.totalorder %s327_s26, %s323_s3 }
  0x2d   :  { %247 = vmatpush3.bf16.msra.mxu0 %v274_v2 }
  0x2e   :  { %p330_p5 = por %p329_p4, %p328_p3 }
  0x30   :  { %249 = vmatmul.mubr.msk.bf16.vlgmr.msra.gmra.mrb[0].mxu0 %vm77_vm1, %v53_v5  ;;  %p331_p6 = pnand %p330_p5, %p324_p2 }
 0x103   :  { %v115_v8 = vpop.f32.mrb[0].mxu0 }
 0x104   :  { %v116_v9 = vadd.f32 %v230_v7, %v115_v8  ;;  %v250_v10 = vpop.f32.mrb[1].mxu0 }
 0x105   :  { %v118_v11 = vpop.f32.mrb[2].mxu0 }
 0x106   :  { %v119_v12 = vadd.f32 %v230_v7, %v118_v11  ;;  %v251_v13 = vpop.f32.mrb[3].mxu0  ;;  %v122_v14 = vmax.f32 %v116_v9, 0.0 }
 0x108   :  { %v123_v15 = vmax.f32 %v119_v12, 0.0 }
 0x10a   :  { %v260_v16 = vpack.c.bf16 %v123_v15, %v122_v14 }
 0x10c   :  { %262 = vmatpush3.bf16.xpose.msk.msra.mxu1 %vm261_vm2, %v260_v16 }
 0x113   :  { %257 = vmatmul.mubr.msk.f32.vlgmr.msra.gmra.mrb[0].mxu1 %vm77_vm1, %v124_v17 }
 0x1e6   :  { %v202_v19 = vpop.f32.mrb[0].mxu1 }
 0x1e7   :  { %v203_v20 = vadd.f32 %v202_v19, %v126_v18  ;;  %v258_v21 = vpop.f32.mrb[1].mxu1 }
 0x1e9   :  { %v237_v22 = vmul.f32 -1.442695, %v203_v20 }
 0x1eb   :  { %275 = vpow2.f32 %v237_v22 }
 0x1f5   :  { %v276_v23 = vpop.eup %275 }
 0x1f6   :  { %v209_v24 = vadd.f32 1.0, %v276_v23 }
 0x1f8   :  { %277 = vrcp.f32 %v209_v24 }
 0x202   :  { %v278_v25 = vpop.eup %277 }
 0x203   :  { %213 = vst.msk [vmem:[#allocation8] sm:$0x1] %vm212_vm3, %v278_v25 }
 0x204   :  { %334 = shalt.err (!%p331_p6)
}
 0x205   :  { %s335_s28 = scalar_lea.hbm %s445_s5, 16 }
 0x206   :  { %p336_p7 = scmp.ne.s32.totalorder %s445_s5, %s335_s28  ;;  %p339_p8 = scmp.lt.u32.totalorder %s335_s28, %s445_s5 }
 0x208   :  { %p341_p9 = pnand %p339_p8, %p336_p7 }
 0x20a   :  { %344 = shalt.err (!%p341_p9)
}
 0x20b   :  { %223 = dma.vmem_to_hbm [thread:$0]  %s221_s25, 16, %s445_s5, [#allocation5]  }
 0x20c   :  { %349 = dma.done.wait [#allocation5], 16  }
 0x20d   :  { %350 = vsyncadd [#allocation5], 4294967280 }
 0x20e   :  { %227 = vsyncpa [#allocation4], 1 }
 0x20f   :  { %228 = vsyncpa [#allocation7], 1 }
 0x210   :  { %229 = vsyncpa [#allocation5], 1 }

</bundles_post_ra>
